<compile_context>
chip_gen: v6e
topology: v6e:2x2x1
jax: 0.10.0
libtpu: 0.0.40
codegen_flags: <defaults>
</compile_context>

<pallas_src>
import functools

import jax
import jax.numpy as jnp
from jax.experimental import pallas as pl
from jax.experimental.pallas import tpu as pltpu

MU = 1.0

_SUBLANE = 8
_LANE = 128
_FALLBACK_VMEM_BYTES = 64 * 1024 * 1024   # v7x per-TC capacity (smallest gen)


def _cdiv(a, b):
    return -(-a // b)


def _round_up(x, m):
    return (x + m - 1) // m * m


def _vmem_capacity_bytes():
    """Generation-aware physical VMEM (128 MiB v5e/v6e, 64 MiB v7x)."""
    try:
        info = pltpu.get_tpu_info()
        for name in ("vmem_capacity_bytes", "vmem_size_bytes"):
            cap = getattr(info, name, None)
            if cap and int(cap) > 0:
                return int(cap)
    except Exception:
        pass
    return _FALLBACK_VMEM_BYTES


def _min_block_rows(itemsize):
    """Min sublane tile per dtype: 8 rows f32, 16 bf16/f16, 32 int8/fp8."""
    return _SUBLANE * max(1, 4 // max(1, int(itemsize)))


def _pick_block_rows(batch, feat, in_itemsize, min_rows, budget, has_dw):
    """Largest row tile (multiple of min_rows) whose working set fits budget."""
    # TODO(synk): tile the feature dimension for vocab-scale C (currently the
    # block always spans the full feature axis).
    feat_pad = _round_up(feat, _LANE)
    # 2 inputs x 2 pipeline buffers (input dtype) + f32 temp headroom per row.
    per_row = feat_pad * (4 * in_itemsize + 4)
    if has_dw:
        per_row += 2 * _LANE * 4          # (rows, 1) f32 dw block, lane padded
    budget = max(budget - _SUBLANE * feat_pad * 4, per_row * min_rows)
    rows = max(min_rows, (budget // per_row) // min_rows * min_rows)
    # Cap at ~half the batch so there are >= 2 row blocks whenever possible
    # and both v7x TensorCores get a parallel slice.
    half = _round_up(max(1, _cdiv(batch, 2)), min_rows)
    rows = min(rows, half)
    return int(max(min_rows, rows))


def _kd_kernel(s_ref, t_ref, out_ref, acc_ref, *,
               block_rows, batch, scale, needs_mask):
    """Scalar-dw path: fold (s-t)^2 row groups into an (8, C) f32 accumulator."""
    i = pl.program_id(1)

    @pl.when(i == 0)
    def _init():
        acc_ref[...] = jnp.zeros_like(acc_ref)

    d = s_ref[...].astype(jnp.float32) - t_ref[...].astype(jnp.float32)
    sq = d * d
    if needs_mask:
        blk = pl.program_id(0) * pl.num_programs(1) + i       # unclamped block id
        row = blk * block_rows + jax.lax.broadcasted_iota(jnp.int32, sq.shape, 0)
        sq = jnp.where(row < batch, sq, 0.0)
    groups = block_rows // _SUBLANE
    # Pure VPU adds across sublane groups; no per-element VMEM RMW.
    acc_ref[...] += sq.reshape(groups, _SUBLANE, sq.shape[-1]).sum(axis=0)

    @pl.when(i == pl.num_programs(1) - 1)
    def _finalize():
        total = jnp.sum(acc_ref[...]) * scale                 # one XLU reduce/slice
        out_ref[...] = jnp.broadcast_to(total, out_ref.shape)


def _kd_kernel_dw(dw_ref, s_ref, t_ref, out_ref, acc_ref, *,
                  block_rows, batch, scale, needs_mask):
    """Per-sample dw: reduce over features first (XLU), weight per row second."""
    i = pl.program_id(1)

    @pl.when(i == 0)
    def _init():
        acc_ref[...] = jnp.zeros_like(acc_ref)

    d = s_ref[...].astype(jnp.float32) - t_ref[...].astype(jnp.float32)
    row_sums = jnp.sum(d * d, axis=1, keepdims=True)          # (rows, 1), XLU
    weighted = row_sums * dw_ref[...].astype(jnp.float32)     # (rows, 1), tiny VPU
    if needs_mask:
        blk = pl.program_id(0) * pl.num_programs(1) + i
        row = blk * block_rows + jax.lax.broadcasted_iota(
            jnp.int32, weighted.shape, 0)
        weighted = jnp.where(row < batch, weighted, 0.0)
    groups = block_rows // _SUBLANE
    acc_ref[...] += weighted.reshape(groups, _SUBLANE, 1).sum(axis=0)

    @pl.when(i == pl.num_programs(1) - 1)
    def _finalize():
        total = jnp.sum(acc_ref[...]) * scale
        out_ref[...] = jnp.broadcast_to(total, out_ref.shape)


def kd_distillation_loss(scores, target_scores, dw_kd=1.0, *, block_rows=None):
    """Pallas equivalent of Loss.forward. scores/target_scores: (B, C)."""
    assert scores.ndim == 2 and scores.shape == target_scores.shape
    B, C = scores.shape

    dw = jnp.asarray(dw_kd)
    has_dw = dw.ndim != 0

    in_itemsize = max(scores.dtype.itemsize, target_scores.dtype.itemsize)
    min_rows = _min_block_rows(in_itemsize)
    vmem_cap = _vmem_capacity_bytes()
    block_budget = vmem_cap // 3
    vmem_limit = int(min(vmem_cap * 3 // 4, vmem_cap - 4 * 1024 * 1024))

    if block_rows is None:
        block_rows = _pick_block_rows(B, C, in_itemsize, min_rows,
                                      block_budget, has_dw)
    assert block_rows % min_rows == 0, (
        f"block_rows must be a multiple of {min_rows} for dtype {scores.dtype}")

    nblocks = _cdiv(B, block_rows)              # no wrapper-side padding/HBM copies
    n_par = 2 if nblocks >= 2 else 1            # keep both v7x TensorCores busy
    n_inner = _cdiv(nblocks, n_par)
    grid = (n_par, n_inner)
    # Mask ragged tail rows and the (clamped) duplicate block of an odd split.
    needs_mask = n_par * n_inner * block_rows > B

    scale = MU / (B * C)                        # fold mean() / size(1) into kernel

    def row_index_map(p, i):
        # Clamp so any duplicate block of an odd split still reads valid memory;
        # its rows are >= B and get masked to zero in-kernel.
        return (jnp.minimum(p * n_inner + i, nblocks - 1), 0)

    row_spec = pl.BlockSpec((block_rows, C), row_index_map)
    out_spec = pl.BlockSpec((1, _SUBLANE, _LANE), lambda p, i: (p, 0, 0))
    out_shape = jax.ShapeDtypeStruct((n_par, _SUBLANE, _LANE), jnp.float32)
    cparams = pltpu.CompilerParams(
        dimension_semantics=("parallel", "arbitrary"),
        vmem_limit_bytes=vmem_limit,
    )

    if not has_dw:
        # Scalar dw: no dw input at all; apply the scalar in the wrapper.
        acc = pltpu.VMEM((_SUBLANE, C), jnp.float32)
        partials = pl.pallas_call(
            functools.partial(_kd_kernel, block_rows=block_rows, batch=B,
                              scale=scale, needs_mask=needs_mask),
            out_shape=out_shape,
            grid_spec=pltpu.PrefetchScalarGridSpec(
                num_scalar_prefetch=0,
                grid=grid,
                in_specs=[row_spec, row_spec],
                out_specs=out_spec,
                scratch_shapes=[acc],
            ),
            compiler_params=cparams,
        )(scores, target_scores)
        return jnp.sum(partials[:, 0, 0]) * dw.astype(jnp.float32)

    # Per-sample dw: normalize to (B, 1) f32, streamed per step (tiny DMA,
    # fully hidden behind the input DMAs; no VMEM-resident copy).
    if dw.ndim == 2 and dw.shape[-1] == 1:
        dw = dw[:, 0]
    if dw.ndim != 1 or dw.shape[0] != B:
        raise ValueError(
            f"dw_KD must be a scalar or have {B} entries, got shape {dw.shape}")
    dw = dw.astype(jnp.float32).reshape(B, 1)
    dw_spec = pl.BlockSpec((block_rows, 1), row_index_map)
    acc = pltpu.VMEM((_SUBLANE, 1), jnp.float32)

    partials = pl.pallas_call(
        functools.partial(_kd_kernel_dw, block_rows=block_rows, batch=B,
                          scale=scale, needs_mask=needs_mask),
        out_shape=out_shape,
        grid_spec=pltpu.PrefetchScalarGridSpec(
            num_scalar_prefetch=0,
            grid=grid,
            in_specs=[dw_spec, row_spec, row_spec],
            out_specs=out_spec,
            scratch_shapes=[acc],
        ),
        compiler_params=cparams,
    )(dw, scores, target_scores)
    return jnp.sum(partials[:, 0, 0])


def _reference(scores, target_scores, dw_kd=1.0):
    s = scores.astype(jnp.float32)
    t = target_scores.astype(jnp.float32)
    per_b = ((s - t) ** 2).sum(axis=1) * jnp.asarray(dw_kd, jnp.float32)
    return MU * per_b.mean() / scores.shape[1]


def _check(name, out, ref, rtol=1e-4, atol=1e-6):
    assert jnp.allclose(out, ref, rtol=rtol, atol=atol), (name, out, ref)


if __name__ == "__main__":
    key = jax.random.PRNGKey(0)
    k1, k2, k3, k4, k5, k6, k7 = jax.random.split(key, 7)

    # case 1: f32, scalar dw, auto tile -> 2 row blocks, 2-way parallel axis
    B, C = 16, 128
    s = jax.random.normal(k1, (B, C), jnp.float32)
    t = jax.random.normal(k2, (B, C), jnp.float32)
    out1 = jax.block_until_ready(kd_distillation_loss(s, t, 1.0))
    _check("case1", out1, _reference(s, t, 1.0))

    # case 2: f32, per-sample dw (streamed dw blocks, reduce-first path)
    dw = jax.random.uniform(k3, (B,), jnp.float32)
    out2 = jax.block_until_ready(kd_distillation_loss(s, t, dw))
    _check("case2", out2, _reference(s, t, dw))

    # case 3: ragged batch (B % block_rows != 0) + per-sample dw, in-kernel mask
    B3, C3 = 10, 64
    s3 = jax.random.normal(k4, (B3, C3), jnp.float32)
    t3 = jax.random.normal(k5, (B3, C3), jnp.float32)
    dw3 = jnp.linspace(0.1, 1.0, B3, dtype=jnp.float32)
    out3 = jax.block_until_ready(kd_distillation_loss(s3, t3, dw3, block_rows=8))
    _check("case3", out3, _reference(s3, t3, dw3))

    # case 4: bf16 inputs, scalar dw, block_rows at the bf16 min tile (16)
    B4, C4 = 32, 128
    s4 = jax.random.normal(k1, (B4, C4), jnp.float32).astype(jnp.bfloat16)
    t4 = jax.random.normal(k2, (B4, C4), jnp.float32).astype(jnp.bfloat16)
    out4 = jax.block_until_ready(kd_distillation_loss(s4, t4, 0.5, block_rows=16))
    _check("case4", out4, _reference(s4, t4, 0.5))

    # case 5: odd block count -> clamped, fully-masked duplicate block on the
    # second parallel slice, with per-sample dw
    B5, C5 = 24, 128
    s5 = jax.random.normal(k6, (B5, C5), jnp.float32)
    t5 = jax.random.normal(k7, (B5, C5), jnp.float32)
    dw5 = jax.random.uniform(k3, (B5,), jnp.float32)
    out5 = jax.block_until_ready(kd_distillation_loss(s5, t5, dw5, block_rows=8))
    _check("case5", out5, _reference(s5, t5, dw5))

    # case 6: bf16, ragged batch, scalar dw, auto tile selection (min tile 16)
    B6, C6 = 40, 128
    s6 = jax.random.normal(k4, (B6, C6), jnp.float32).astype(jnp.bfloat16)
    t6 = jax.random.normal(k5, (B6, C6), jnp.float32).astype(jnp.bfloat16)
    out6 = jax.block_until_ready(kd_distillation_loss(s6, t6, 0.25))
    _check("case6", out6, _reference(s6, t6, 0.25))

    print("KERNEL_OK")
</pallas_src>

<mosaic_0001>
module attributes {stable_mosaic.version = 11 : i64} {
  func.func @_kd_kernel(%arg0: i32, %arg1: i32, %arg2: memref<8x128xf32, #tpu.memory_space<vmem>>, %arg3: memref<8x128xf32, #tpu.memory_space<vmem>>, %arg4: memref<1x8x128xf32, #tpu.memory_space<vmem>>, %arg5: memref<8x128xf32, #tpu.memory_space<vmem>>) attributes {dimension_semantics = [#tpu.dimension_semantics<parallel>, #tpu.dimension_semantics<arbitrary>], iteration_bounds = array<i64: 2, 1>, scalar_prefetch = 0 : i64, scratch_operands = 1 : i64, tpu.core_type = #tpu.core_type<tc>, window_params = [{transform_indices = @transform_0, window_bounds = array<i64: 8, 128>}, {transform_indices = @transform_1, window_bounds = array<i64: 8, 128>}, {transform_indices = @transform_2, window_bounds = array<i64: 1, 8, 128>}]} {
    %c0_i32 = arith.constant 0 : i32
    %0 = arith.cmpi eq, %arg1, %c0_i32 : i32
    %1 = arith.extui %0 : i1 to i32
    %c0_i32_0 = arith.constant 0 : i32
    %2 = arith.cmpi ne, %1, %c0_i32_0 : i32
    scf.if %2 {
      %cst_10 = arith.constant 0.000000e+00 : f32
      %15 = vector.broadcast %cst_10 : f32 to vector<8x128xf32>
      %c0_11 = arith.constant 0 : index
      %c0_12 = arith.constant 0 : index
      %16 = vector.load %arg5[%c0_11, %c0_12] : memref<8x128xf32, #tpu.memory_space<vmem>>, vector<8x128xf32>
      tpu.vector_store %arg5[%c0_11, %c0_12], %15 {strides = array<i32>} : memref<8x128xf32, #tpu.memory_space<vmem>>, vector<8x128xf32>,
    } else {
    }
    %c0 = arith.constant 0 : index
    %c0_1 = arith.constant 0 : index
    %3 = vector.load %arg2[%c0, %c0_1] : memref<8x128xf32, #tpu.memory_space<vmem>>, vector<8x128xf32>
    %c0_2 = arith.constant 0 : index
    %c0_3 = arith.constant 0 : index
    %4 = vector.load %arg3[%c0_2, %c0_3] : memref<8x128xf32, #tpu.memory_space<vmem>>, vector<8x128xf32>
    %5 = arith.subf %3, %4 : vector<8x128xf32>
    %6 = arith.mulf %5, %5 : vector<8x128xf32>
    %c0_4 = arith.constant 0 : index
    %c0_5 = arith.constant 0 : index
    %7 = vector.load %arg5[%c0_4, %c0_5] : memref<8x128xf32, #tpu.memory_space<vmem>>, vector<8x128xf32>
    %8 = vector.shape_cast %6 : vector<8x128xf32> to vector<1x8x128xf32>
    %cst = arith.constant dense<0.000000e+00> : vector<8x128xf32>
    %9 = vector.multi_reduction <add>, %8, %cst [0] : vector<1x8x128xf32> to vector<8x128xf32>
    %10 = arith.addf %7, %9 : vector<8x128xf32>
    %c0_6 = arith.constant 0 : index
    %c0_7 = arith.constant 0 : index
    %11 = vector.load %arg5[%c0_6, %c0_7] : memref<8x128xf32, #tpu.memory_space<vmem>>, vector<8x128xf32>
    tpu.vector_store %arg5[%c0_6, %c0_7], %10 {strides = array<i32>} : memref<8x128xf32, #tpu.memory_space<vmem>>, vector<8x128xf32>,
    %c0_i32_8 = arith.constant 0 : i32
    %12 = arith.cmpi eq, %arg1, %c0_i32_8 : i32
    %13 = arith.extui %12 : i1 to i32
    %c0_i32_9 = arith.constant 0 : i32
    %14 = arith.cmpi ne, %13, %c0_i32_9 : i32
    scf.if %14 {
      %c0_10 = arith.constant 0 : index
      %c0_11 = arith.constant 0 : index
      %15 = vector.load %arg5[%c0_10, %c0_11] : memref<8x128xf32, #tpu.memory_space<vmem>>, vector<8x128xf32>
      %16 = vector.shape_cast %15 : vector<8x128xf32> to vector<1x8x128xf32>
      %cst_12 = arith.constant dense<0.000000e+00> : vector<1xf32>
      %17 = vector.multi_reduction <add>, %16, %cst_12 [1, 2] : vector<1x8x128xf32> to vector<1xf32>
      %18 = vector.shape_cast %17 : vector<1xf32> to vector<1x1x1xf32>
      %19 = vector.extract %18[0, 0, 0] : f32 from vector<1x1x1xf32>
      %cst_13 = arith.constant 4.8828125E-4 : f32
      %20 = arith.mulf %19, %cst_13 : f32
      %21 = vector.broadcast %20 : f32 to vector<1x8x128xf32>
      %c0_14 = arith.constant 0 : index
      %c0_15 = arith.constant 0 : index
      %c0_16 = arith.constant 0 : index
      %22 = vector.load %arg4[%c0_14, %c0_15, %c0_16] : memref<1x8x128xf32, #tpu.memory_space<vmem>>, vector<1x8x128xf32>
      tpu.vector_store %arg4[%c0_14, %c0_15, %c0_16], %21 {strides = array<i32>} : memref<1x8x128xf32, #tpu.memory_space<vmem>>, vector<1x8x128xf32>,
    } else {
    }
    return
  }
  func.func @transform_0(%arg0: i32, %arg1: i32) -> (i32, i32) {
    %c1_i32 = arith.constant 1 : i32
    %0 = arith.muli %arg0, %c1_i32 : i32
    %1 = arith.addi %0, %arg1 : i32
    %c1_i32_0 = arith.constant 1 : i32
    %2 = arith.minsi %1, %c1_i32_0 : i32
    %c0_i32 = arith.constant 0 : i32
    %c0_i32_1 = arith.constant 0 : i32
    return %2, %c0_i32 : i32, i32
  }
  func.func @transform_1(%arg0: i32, %arg1: i32) -> (i32, i32) {
    %c1_i32 = arith.constant 1 : i32
    %0 = arith.muli %arg0, %c1_i32 : i32
    %1 = arith.addi %0, %arg1 : i32
    %c1_i32_0 = arith.constant 1 : i32
    %2 = arith.minsi %1, %c1_i32_0 : i32
    %c0_i32 = arith.constant 0 : i32
    %c0_i32_1 = arith.constant 0 : i32
    return %2, %c0_i32 : i32, i32
  }
  func.func @transform_2(%arg0: i32, %arg1: i32) -> (i32, i32, i32) {
    %c0_i32 = arith.constant 0 : i32
    %c0_i32_0 = arith.constant 0 : i32
    %c0_i32_1 = arith.constant 0 : i32
    return %arg0, %c0_i32, %c0_i32_0 : i32, i32, i32
  }
}

</mosaic_0001>

<bundles_post_ra>
// kernel: tpu_custom_call.1
= control target key start
LH: loop header
LB: loop body
LE: loop exit
PB: predicated region body
PF: predicated region fallthrough
CT: control target
= control target key end

     0   :  { %s867_s0 = inlined_call_operand.hbm [shape: f32[16,128], index: 0, kind: input, shape index: {}]   ;;  %s868_s1 = inlined_call_operand.hbm [shape: f32[16,128], index: 1, kind: input, shape index: {}]   ;;  %s869_s2 = inlined_call_operand.hbm [shape: f32[2,8,128], index: 2, kind: output, shape index: {}]  }
   0x1   :  { %870 = sst [smem:[#allocation12_spill]] %s867_s0 }
   0x2   :  { %7 = vsyncpa [#allocation4], 0 }
   0x3   :  { %9 = vsyncpa [#allocation4 + $0x1], 0 }
   0x4   :  { %10 = vsyncpa [#allocation7], 0 }
   0x5   :  { %12 = vsyncpa [#allocation7 + $0x1], 0 }
   0x6   :  { %13 = vsyncpa [#allocation5], 0 }
   0x7   :  { %15 = vsyncpa [#allocation5 + $0x1], 0  ;;  %s669_s9 = smov 0   ;;  %s671_s10 = smov 0  }
   0x8   :  { %s673_s11 = smov 0   ;;  %s675_s12 = smov 0  }
   0x9   :  { %s677_s13 = smov 0   ;;  %s679_s14 = smov 0  }
   0xa   :  { %s681_s15 = smov 0   ;;  %s683_s16 = smov 0  }
   0xb   :  { %s685_s17 = smov 0  }
   0xc LB: > { %s376_s18 = sadd.s32 4294967295, %s649_s17   ;;  %s377_s19 = sadd.s32 4294967294, %s649_s17   ;;  %s649_s17 = sphi %s685_s17, %s21_s17   ;;  %s645_s16 = sphi %s683_s16, %s886_s16   ;;  %s641_s15 = sphi %s681_s15, %s885_s15   ;;  %s637_s14 = sphi %s679_s14, %s884_s14   ;;  %s633_s13 = sphi %s677_s13, %s883_s13   ;;  %s629_s12 = sphi %s675_s12, %s882_s12   ;;  %s625_s11 = sphi %s673_s11, %s881_s11   ;;  %s621_s10 = sphi %s671_s10, %s880_s10   ;;  %s617_s9 = sphi %s669_s9, %s879_s9  }
   0xd   : > { %s33_s20 = sadd.s32 1, %s645_s16  ;;  %p38_p0 = scmp.lt.s32.totalorder %s645_s16, 1 }
   0xe   : > { %p35_p1 = scmp.ge.s32.totalorder %s33_s20, 2  ;;  %s46_s21 = sadd.s32 1, %s637_s14 }
   0xf   : > { %s718_s22 = scalar_select %p38_p0, %s645_s16, 1 }
  0x10   : > { %s888_s20 = smov (%p35_p1, %s33_s20), 0  ;;  %p53_p2 = scmp.ne.s32.totalorder %s637_s14, %s633_s13 }
  0x11   : > { %p54_p3 = scmp.eq.s32.totalorder %s649_s17, 0  ;;  %p41_p4 = scmp.lt.s32.totalorder %s888_s20, 1 }
  0x12   : > { %p59_p5 = scmp.ne.s32.totalorder %s633_s13, %s629_s12  ;;  %p60_p7 = scmp.eq.s32.totalorder %s376_s18, 0 }
  0x13   : > { %p727_p6 = por %p54_p3, %p53_p2  ;;  %s101_s26 = ssub.s32 %s645_s16, %s888_s20 }
  0x14   : > { %s42_s24 = scalar_select %p41_p4, %s888_s20, 1 }
  0x15   : > { %p732_p8 = por %p60_p7, %p59_p5  ;;  %p102_p9 = scmp.eq.s32.totalorder %s101_s26, 0 }
  0x16   : > { %s43_s27 = ssub.s32 %s718_s22, %s42_s24  ;;  %s104_s28 = sadd.s32 1, %s625_s11 }
  0x17   : > { %p44_p10 = scmp.eq.s32.totalorder %s43_s27, 0  ;;  %p114_p11 = scmp.ne.s32.totalorder %s625_s11, %s621_s10 }
  0x18   : > { %s741_s29 = scalar_select %p102_p9, %s625_s11, %s104_s28  }
  0x19   : > { %s744_s30 = scalar_select %p44_p10, %s637_s14, %s46_s21  }
  0x1a   : > { %p115_p12 = scmp.eq.s32.totalorder %s376_s18, 1  ;;  %p120_p13 = scmp.ne.s32.totalorder %s621_s10, %s617_s9 }
  0x1b   : > { %p121_p0 = scmp.eq.s32.totalorder %s377_s19, 1  ;;  %p411_p4 = scmp.lt.s32.totalorder %s649_s17, 2 }
  0x1c   : > { %p750_p1 = por %p115_p12, %p114_p11  ;;  %s761_s5 = sand.u32 1, %s637_s14  }
  0x1d   : > { %p755_p3 = por %p121_p0, %p120_p13  ;;  %s381_s6 = sshll.u32 %s718_s22, 7 }
  0x1e   : > { %s380_s7 = sshll.u32 %s761_s5, 3  ;;  %s875_s0 = sld [smem:[#allocation12_spill]] }
  0x1f   : > { %s145_s19 = scalar_lea.vmem [#allocation3], %s380_s7  ;;  %p770_p5 = pnand %p411_p4, %p727_p6 }
  0x20   : > { %s155_s21 = sshll.u32 %s145_s19, 4  ;;  %p384_p7 = scmp.ge.s32.totalorder %s649_s17, 1  ;;  %s156_s21 = int_to_ptr.vmem [resolvable:$true] %s155_s21 }
  0x21   : > { %p181_p9 = scmp.lt.s32.totalorder %s649_s17, 3  ;;  %s142_s26 = scalar_lea.sflag [#allocation4], %s761_s5 }
  0x22   : > { %p487_p10 = pneg %p770_p5  ;;  %s498_s22 = scalar_lea.vmem %s156_s21, 128 }
  0x23   : > { %p499_p11 = scmp.ne.s32.totalorder %s156_s21, %s498_s22  ;;  %s651_s27 = smov [#allocation3]  }
  0x24   : > { %s153_s18 = scalar_lea.hbm %s875_s0, %s381_s6  ;;  %s503_s23 = sshll.u32 %s651_s27, 4  ;;  %s504_s23 = int_to_ptr.vmem [resolvable:$false] %s503_s23 }
  0x25   : > { %p501_p12 = pnand %p499_p11, %p487_p10  ;;  %s505_s28 = scalar_lea.vmem %s504_s23, 256 }
  0x26   : > { %p506_p6 = scmp.lt.s32.totalorder %s156_s21, %s504_s23  ;;  %p507_p0 = scmp.lt.s32.totalorder %s505_s28, %s498_s22 }
  0x27   : > { %p502_p13 = pneg %p501_p12 }
  0x28   : > { %p508_p4 = por %p507_p0, %p506_p6 }
  0x2a   : > { %p509_p2 = pnand %p508_p4, %p502_p13 }
  0x2c   : > { %512 = shalt.err (!%p509_p2)
}
  0x2d   : > { %403 = dma.hbm_to_vmem [thread:$0]  (!%p770_p5), %s153_s18, 128, %s156_s21, %s142_s26  }
  0x2e   : > { %p788_p11 = pnand %p384_p7, %p181_p9  ;;  %s174_s22 = scalar_lea.hbm %s868_s1, %s381_s6 }
  0x2f   : > { %s166_s27 = scalar_lea.vmem [#allocation6], %s380_s7  ;;  %s163_s28 = scalar_lea.sflag [#allocation7], %s761_s5 }
  0x30   : > { %s176_s23 = sshll.u32 %s166_s27, 4  ;;  %s652_s18 = smov [#allocation6]   ;;  %s177_s23 = int_to_ptr.vmem [resolvable:$true] %s176_s23 }
  0x31   : > { %s526_s0 = scalar_lea.vmem %s177_s23, 128  ;;  %s531_s21 = sshll.u32 %s652_s18, 4  ;;  %s532_s21 = int_to_ptr.vmem [resolvable:$false] %s531_s21 }
  0x32   : > { %p527_p2 = scmp.ne.s32.totalorder %s177_s23, %s526_s0  ;;  %s533_s26 = scalar_lea.vmem %s532_s21, 256 }
  0x33   : > { %p534_p7 = scmp.lt.s32.totalorder %s177_s23, %s532_s21  ;;  %p535_p9 = scmp.lt.s32.totalorder %s533_s26, %s526_s0 }
  0x34   : > { %p529_p12 = pnand %p527_p2, %p487_p10 }
  0x35   : > { %p536_p6 = por %p535_p9, %p534_p7 }
  0x36   : > { %p530_p13 = pneg %p529_p12 }
  0x38   : > { %p537_p0 = pnand %p536_p6, %p530_p13 }
  0x3a   : > { %540 = shalt.err (!%p537_p0)
}
  0x3b   : > { %406 = dma.hbm_to_vmem [thread:$0]  (!%p770_p5), %s174_s22, 128, %s177_s23, %s163_s28  }
  0x3c   : > { %185 = sbr.rel (%p788_p11) target bundleno = 289 (0x121), region = 28  ;;  %s187_s5 = sand.u32 (!%p788_p11), 1, %s633_s13  }
  0x3d   : > { %s385_s6 = sshll.u32 (!%p788_p11), %s187_s5, 3  ;;  %s188_s7 = scalar_lea.sflag (!%p788_p11), [#allocation4], %s187_s5 }
  0x3e   : > { %s191_s12 = scalar_lea.vmem (!%p788_p11), [#allocation3], %s385_s6 }
  0x41   : > { %604 = dma.done.wait (%p732_p8), %s188_s7, 128  }
  0x42   : > { %606 = vsyncadd (%p732_p8), %s188_s7, 4294967168  ;;  %s197_s0 = scalar_lea.sflag [#allocation7], %s187_s5  ;;  %s200_s19 = scalar_lea.vmem [#allocation6], %s385_s6 }
  0x43   : > { %608 = dma.done.wait (%p732_p8), %s197_s0, 128  }
  0x44   : > { %610 = vsyncadd (%p732_p8), %s197_s0, 4294967168  ;;  %v237_v0 = vld [vmem:[%s191_s12] sm:$0xff]  ;;  %v238_v1 = vld [vmem:[%s200_s19] sm:$0xff]  ;;  %s223_s24 = sand.u32 1, %s621_s10   ;;  %s389_s27 = sshll.u32 %s641_s15, 7 }
  0x45   : > { %v239_v2 = vsub.f32 %v237_v0, %v238_v1  ;;  %s387_s8 = sshll.u32 %s223_s24, 3  ;;  %s817_s26 = scalar_lea.hbm %s869_s2, %s389_s27 }
  0x46   : > { %s225_s25 = scalar_lea.vmem [#allocation8], %s387_s8  ;;  %s262_s5 = scalar_lea.sflag [#allocation5], %s223_s24 }
  0x47   : > { %v240_v3 = vmul.f32 %v239_v2, %v239_v2  ;;  %s275_s22 = sshll.u32 %s225_s25, 4  ;;  %s653_s7 = smov [#allocation8]   ;;  %s276_s22 = int_to_ptr.vmem [resolvable:$true] %s275_s22 }
  0x48   : > { %s541_s6 = scalar_lea.vmem %s276_s22, 128  ;;  %s545_s12 = sshll.u32 %s653_s7, 4  ;;  %s546_s12 = int_to_ptr.vmem [resolvable:$false] %s545_s12 }
  0x49   : > { %249 = vadd.xlane.f32.xlu0 %v240_v3  ;;  %p542_p8 = scmp.ne.s32.totalorder %s276_s22, %s541_s6  ;;  %s547_s15 = scalar_lea.vmem %s546_s12, 256 }
  0x4a   : > { %p548_p4 = scmp.lt.s32.totalorder %s276_s22, %s546_s12  ;;  %p549_p11 = scmp.lt.s32.totalorder %s547_s15, %s541_s6 }
  0x4b   : > { %p543_p5 = pnand %p542_p8, %p750_p1 }
  0x4c   : > { %p550_p2 = por %p549_p11, %p548_p4 }
  0x4d   : > { %p544_p10 = pneg %p543_p5 }
  0x4f   : > { %p551_p12 = pnand %p550_p2, %p544_p10 }
  0xd2   : > { %v250_v4 = vpop.xlane.xlu0 %249 }
  0xd3   : > { %v251_v5 = vrot.slane %v250_v4, 4 }
  0xd5   : > { %v252_v6 = vadd.f32 %v251_v5, %v250_v4 }
  0xd7   : > { %v253_v7 = vrot.slane %v252_v6, 2 }
  0xd9   : > { %v254_v8 = vadd.f32 %v253_v7, %v252_v6 }
  0xdb   : > { %v255_v9 = vrot.slane %v254_v8, 1 }
  0xdd   : > { %v256_v10 = vadd.f32 %v255_v9, %v254_v8 }
  0xdf   : > { %392 = vpush %v256_v10 }
 0x110   : > { %s393_s23 = spop %392 }
 0x111   : > { %s258_s28 = smul.f32 0.00048828125, %s393_s23 }
 0x113   : > { %v259_v11 = vstv %s258_s28 }
 0x114   : > { %260 = vst [vmem:[%s225_s25] sm:$0xff] %v259_v11 }
 0x115   : > { %554 = shalt.err (!%p551_p12)
}
 0x116   : > { %s555_s0 = scalar_lea.hbm %s817_s26, 128  ;;  %s559_s8 = scalar_lea.hbm %s869_s2, 256 }
 0x117   : > { %p556_p13 = scmp.ne.s32.totalorder %s817_s26, %s555_s0  ;;  %p560_p6 = scmp.lt.s32.totalorder %s817_s26, %s869_s2 }
 0x118   : > { %p561_p0 = scmp.lt.s32.totalorder %s559_s8, %s555_s0 }
 0x119   : > { %p557_p7 = pnand %p556_p13, %p750_p1 }
 0x11a   : > { %p562_p8 = por %p561_p0, %p560_p6 }
 0x11b   : > { %p558_p9 = pneg %p557_p7 }
 0x11d   : > { %p563_p5 = pnand %p562_p8, %p558_p9 }
 0x11f   : > { %566 = shalt.err (!%p563_p5)
}
 0x120   : > { %398 = dma.vmem_to_hbm [thread:$0]  (%p750_p1), %s276_s22, 128, %s817_s26, %s262_s5  }
 0x121 PF: > { %s287_s23 = sand.u32 1, %s617_s9   ;;  %p878_p10 = scmp.ge.s32.totalorder %s649_s17, 2 }
 0x122   : > { %s288_s28 = scalar_lea.sflag [#allocation5], %s287_s23 }
 0x123   : > { %p408_p4 = pnand %p878_p10, %p755_p3 }
 0x125   : > { %p409_p11 = pneg %p408_p4 }
 0x127   : > { %612 = dma.done.wait (%p409_p11), %s288_s28, 128  }
 0x128   : > { %614 = vsyncadd (%p409_p11), %s288_s28, 4294967168  ;;  %s21_s17 = sadd.s32 1, %s649_s17   ;;  %s879_s9 = smov %s621_s10 }
 0x129   : > { %p18_p2 = scmp.ge.s32.totalorder %s21_s17, 4   ;;  %s880_s10 = smov %s625_s11 }
 0x12a   : > { %s881_s11 = smov %s741_s29  ;;  %s882_s12 = smov %s633_s13 }
 0x12b   : > { %s883_s13 = smov %s637_s14  ;;  %s884_s14 = smov %s744_s30 }
 0x12c   : > { %s885_s15 = smov %s645_s16  ;;  %s886_s16 = smov %s888_s20 }
 0x12d   :  { %20 = sbr.rel (!%p18_p2) target bundleno = 12 (0xc), region = 94 }
 0x132   :  { %293 = vsyncpa [#allocation4], 1 }
 0x133   :  { %295 = vsyncpa [#allocation4 + $0x1], 1 }
 0x134   :  { %296 = vsyncpa [#allocation7], 1 }
 0x135   :  { %298 = vsyncpa [#allocation7 + $0x1], 1 }
 0x136   :  { %299 = vsyncpa [#allocation5], 1 }
 0x137   :  { %301 = vsyncpa [#allocation5 + $0x1], 1 }

</bundles_post_ra>
